<compile_context>
chip_gen: v7x
topology: tpu7x:2x2x1
jax: 0.10.0
libtpu: 0.0.40
codegen_flags: <defaults>
</compile_context>

<pallas_src>
import jax
import jax.numpy as jnp
from jax.experimental import pallas as pl
from jax.experimental.pallas import tpu as pltpu


def _mlp1d_kernel(x_ref, p_ref, b2_ref, o_ref):
    # x_ref : (1, Bp)   input row (lane-dense)
    # p_ref : (H, 3)    packed params: [:,0]=w1, [:,1]=b1, [:,2]=w2 (columns)
    # b2_ref: (1,)      scalar output bias, in SMEM
    # o_ref : (1, Bp)   lane-dense output row
    p = p_ref[...]                      # (H, 3): one small VMEM tile
    w1 = p[:, 0:1]                      # (H, 1)
    b1 = p[:, 1:2]                      # (H, 1)
    w2 = p[:, 2:3]                      # (H, 1)
    h = jnp.maximum(w1 * x_ref[...] + b1, 0.0)                    # (H, Bp) on VPU
    y = jnp.sum(w2 * h, axis=0, keepdims=True) + b2_ref[0]        # (1, Bp) VPU + XLU
    o_ref[...] = y.astype(o_ref.dtype)


@jax.jit
def regression_forward(x, w1, b1, w2, b2):
    """Forward pass of RegressionByTorch.

    x : (B, n_input)          with n_input == 1
    w1: (n_hidden, n_input)   PyTorch nn.Linear layout
    b1: (n_hidden,)
    w2: (n_output, n_hidden)  with n_output == 1
    b2: (n_output,)
    returns (B, n_output) float32
    """
    B, n_input = x.shape
    n_hidden = w1.shape[0]
    n_output = w2.shape[0]
    assert n_input == 1 and n_output == 1, (
        "kernel specialized to the module's n_input=1 / n_output=1 usage")
    # TODO(synk): general n_input/n_output would need a real (MXU) matmul path.

    dtype = jnp.float32
    # Pad the batch up to a lane multiple so the output store is lane-dense.
    Bp = ((B + 127) // 128) * 128
    x_row = jnp.pad(x.reshape(1, B).astype(dtype), ((0, 0), (0, Bp - B)))

    # Pack w1, b1, w2 columns into one (H, 3) tile -> single VMEM input / DMA.
    params = jnp.concatenate(
        [w1.astype(dtype).reshape(n_hidden, 1),
         b1.astype(dtype).reshape(n_hidden, 1),
         w2.astype(dtype).reshape(n_hidden, 1)],   # (1,H) row -> (H,1) column
        axis=1)
    b2_s = b2.astype(dtype).reshape(1)             # 1-D scalar in SMEM

    y_row = pl.pallas_call(
        _mlp1d_kernel,
        out_shape=jax.ShapeDtypeStruct((1, Bp), dtype),
        in_specs=[
            pl.BlockSpec((1, Bp), lambda: (0, 0)),
            pl.BlockSpec((n_hidden, 3), lambda: (0, 0)),
            pl.BlockSpec(memory_space=pltpu.MemorySpace.SMEM),   # scalar bias b2
        ],
        out_specs=pl.BlockSpec((1, Bp), lambda: (0, 0)),
    )(x_row, params, b2_s)

    # Slice off lane padding and return in PyTorch's (B, n_output) shape.
    return y_row[0, :B].reshape(B, n_output)


if __name__ == "__main__":
    # Shapes implied by the module / get_data(): x is (100, 1); small hidden.
    B, n_input, n_hidden, n_output = 100, 1, 32, 1

    key = jax.random.PRNGKey(0)
    k1, k2, k3, k4 = jax.random.split(key, 4)

    # Deterministic input analogous to t.linspace(-1, 1, 100).unsqueeze(1)
    x = jnp.linspace(-1.0, 1.0, B, dtype=jnp.float32).reshape(B, n_input)

    # Params in PyTorch nn.Linear layout with U(-1/sqrt(fan_in), 1/sqrt(fan_in)) init.
    bound1 = 1.0 / (n_input ** 0.5)
    bound2 = 1.0 / (n_hidden ** 0.5)
    w1 = jax.random.uniform(k1, (n_hidden, n_input), jnp.float32, -bound1, bound1)
    b1 = jax.random.uniform(k2, (n_hidden,), jnp.float32, -bound1, bound1)
    w2 = jax.random.uniform(k3, (n_output, n_hidden), jnp.float32, -bound2, bound2)
    b2 = jax.random.uniform(k4, (n_output,), jnp.float32, -bound2, bound2)

    y = jax.block_until_ready(regression_forward(x, w1, b1, w2, b2))

    # Pure-JAX reference with identical math / params (PyTorch semantics).
    y_ref = jnp.maximum(x @ w1.T + b1[None, :], 0.0) @ w2.T + b2[None, :]
    assert y.shape == (B, n_output)
    assert jnp.allclose(y, y_ref, atol=1e-5, rtol=1e-5)

    print("KERNEL_OK")
</pallas_src>

<mosaic_0001>
module attributes {stable_mosaic.version = 11 : i64} {
  func.func @_mlp1d_kernel(%arg0: memref<1x128xf32, #tpu.memory_space<vmem>>, %arg1: memref<32x3xf32, #tpu.memory_space<vmem>>, %arg2: memref<1xf32, #tpu.memory_space<smem>>, %arg3: memref<1x128xf32, #tpu.memory_space<vmem>>) attributes {dimension_semantics = [], scalar_prefetch = 0 : i64, scratch_operands = 0 : i64, tpu.core_type = #tpu.core_type<tc>} {
    %c0 = arith.constant 0 : index
    %c0_0 = arith.constant 0 : index
    %0 = vector.load %arg1[%c0, %c0_0] : memref<32x3xf32, #tpu.memory_space<vmem>>, vector<32x3xf32>
    %1 = vector.extract_strided_slice %0 {offsets = [0, 0], sizes = [32, 1], strides = [1, 1]} : vector<32x3xf32> to vector<32x1xf32>
    %2 = vector.extract_strided_slice %0 {offsets = [0, 1], sizes = [32, 1], strides = [1, 1]} : vector<32x3xf32> to vector<32x1xf32>
    %3 = vector.extract_strided_slice %0 {offsets = [0, 2], sizes = [32, 1], strides = [1, 1]} : vector<32x3xf32> to vector<32x1xf32>
    %c0_1 = arith.constant 0 : index
    %c0_2 = arith.constant 0 : index
    %4 = vector.load %arg0[%c0_1, %c0_2] : memref<1x128xf32, #tpu.memory_space<vmem>>, vector<1x128xf32>
    %5 = vector.broadcast %1 : vector<32x1xf32> to vector<32x128xf32>
    %6 = vector.broadcast %4 : vector<1x128xf32> to vector<32x128xf32>
    %7 = arith.mulf %5, %6 : vector<32x128xf32>
    %8 = vector.broadcast %2 : vector<32x1xf32> to vector<32x128xf32>
    %9 = arith.addf %7, %8 : vector<32x128xf32>
    %cst = arith.constant 0.000000e+00 : f32
    %10 = vector.broadcast %cst : f32 to vector<32x128xf32>
    %11 = arith.maximumf %9, %10 : vector<32x128xf32>
    %12 = vector.broadcast %3 : vector<32x1xf32> to vector<32x128xf32>
    %13 = arith.mulf %12, %11 : vector<32x128xf32>
    %cst_3 = arith.constant dense<0.000000e+00> : vector<128xf32>
    %14 = vector.multi_reduction <add>, %13, %cst_3 [0] : vector<32x128xf32> to vector<128xf32>
    %15 = vector.shape_cast %14 : vector<128xf32> to vector<1x128xf32>
    %c0_4 = arith.constant 0 : index
    %16 = memref.load %arg2[%c0_4] : memref<1xf32, #tpu.memory_space<smem>>
    %17 = vector.broadcast %16 : f32 to vector<1x128xf32>
    %18 = arith.addf %15, %17 : vector<1x128xf32>
    %c0_5 = arith.constant 0 : index
    %c0_6 = arith.constant 0 : index
    %19 = vector.load %arg3[%c0_5, %c0_6] : memref<1x128xf32, #tpu.memory_space<vmem>>, vector<1x128xf32>
    tpu.vector_store %arg3[%c0_5, %c0_6], %18 {strides = array<i32>} : memref<1x128xf32, #tpu.memory_space<vmem>>, vector<1x128xf32>,
    return
  }
}

</mosaic_0001>

<bundles_post_ra>
// kernel: regression_forward.1
= control target key start
LH: loop header
LB: loop body
LE: loop exit
PB: predicated region body
PF: predicated region fallthrough
CT: control target
= control target key end

     0   :  { %v123_v0 = vmov 0   ;;  %v124_v4 = vmov 1   ;;  %v125_v6 = vmov 2   ;;  %s167_s1 = inlined_call_operand.vmem [shape: f32[32,3], index: 1, kind: input, shape index: {}]   ;;  %s168_s0 = inlined_call_operand.vmem [shape: f32[1,128], index: 0, kind: input, shape index: {}]   ;;  %s169_s2 = inlined_call_operand.<no memory space> [shape: f32[1], index: 2, kind: input, shape index: {}]   ;;  %s170_s3 = inlined_call_operand.vmem [shape: f32[1,128], index: 3, kind: output, shape index: {}]  }
   0x1   :  { %116 = vset.pattern.permute.xlu1 %v123_v0  ;;  %115 = vset.pattern.permute.xlu0 %v123_v0  ;;  %v17_v1 = vld [vmem:[%s167_s1 + $0x10] sm:$0xff]  ;;  %v15_v2 = vld [vmem:[%s167_s1] sm:$0xff]  ;;  %v16_v3 = vld [vmem:[%s167_s1 + $0x8] sm:$0xff]  ;;  %v104_v44 = vstv %s169_s2 }
   0x2   :  { %32 = vperm.xlu1 %116, %v17_v1   ;;  %22 = vperm.xlu0 %115, %v15_v2   ;;  %v18_v5 = vld [vmem:[%s167_s1 + $0x18] sm:$0xff]  ;;  %v111_v13 = vld [vmem:[%s168_s0] ss:$0 sm:$0xff] }
   0x6   :  { %117 = vset.pattern.permute.xlu1 %v124_v4  ;;  %27 = vperm.xlu0 %115, %v16_v3  }
   0x7   :  { %51 = vperm.xlu1 %117, %v15_v2  }
   0xa   :  { %118 = vset.pattern.permute.xlu0 %v124_v4 }
   0xb   :  { %119 = vset.pattern.permute.xlu1 %v123_v0  ;;  %55 = vperm.xlu0 %118, %v16_v3  }
   0xc   :  { %37 = vperm.xlu1 %119, %v18_v5  }
   0xf   :  { %63 = vperm.xlu0 %118, %v18_v5  }
  0x10   :  { %120 = vset.pattern.permute.xlu1 %v124_v4 }
  0x11   :  { %59 = vperm.xlu1 %120, %v17_v1  }
  0x13   :  { %122 = vset.pattern.permute.xlu0 %v125_v6 }
  0x14   :  { %79 = vperm.xlu0 %122, %v16_v3  }
  0x15   :  { %121 = vset.pattern.permute.xlu1 %v125_v6 }
  0x16   :  { %75 = vperm.xlu1 %121, %v15_v2  }
  0x1a   :  { %83 = vperm.xlu1 %121, %v17_v1  }
  0x1e   :  { %87 = vperm.xlu1 %121, %v18_v5  }
  0x81   :  { %v33_v7 = vpop.permute.xlu1 %32  ;;  %v23_v8 = vpop.permute.xlu0 %22 }
  0x82   :  { %v46_v14 = vmul.f32 %v111_v13, %v23_v8  ;;  %v48_v18 = vmul.f32 %v111_v13, %v33_v7 }
  0x85   :  { %v28_v9 = vpop.permute.xlu0 %27 }
  0x86   :  { %v52_v10 = vpop.permute.xlu1 %51  ;;  %v47_v15 = vmul.f32 %v111_v13, %v28_v9 }
  0x87   :  { %v66_v19 = vadd.f32 %v52_v10, %v46_v14 }
  0x89   :  { %v70_v24 = vmax.f32 %v66_v19, 0.0 }
  0x8a   :  { %v56_v11 = vpop.permute.xlu0 %55 }
  0x8b   :  { %v38_v12 = vpop.permute.xlu1 %37  ;;  %v67_v20 = vadd.f32 %v56_v11, %v47_v15 }
  0x8c   :  { %v49_v21 = vmul.f32 %v111_v13, %v38_v12 }
  0x8d   :  { %v71_v26 = vmax.f32 %v67_v20, 0.0 }
  0x8e   :  { %v64_v17 = vpop.permute.xlu0 %63 }
  0x8f   :  { %v69_v27 = vadd.f32 %v64_v17, %v49_v21 }
  0x90   :  { %v60_v16 = vpop.permute.xlu1 %59 }
  0x91   :  { %v68_v22 = vadd.f32 %v60_v16, %v48_v18  ;;  %v73_v33 = vmax.f32 %v69_v27, 0.0 }
  0x93   :  { %v80_v25 = vpop.permute.xlu0 %79  ;;  %v72_v28 = vmax.f32 %v68_v22, 0.0 }
  0x94   :  { %v91_v31 = vmul.f32 %v80_v25, %v71_v26 }
  0x95   :  { %v76_v23 = vpop.permute.xlu1 %75 }
  0x96   :  { %v90_v29 = vmul.f32 %v76_v23, %v70_v24 }
  0x98   :  { %v94_v34 = vadd.f32 %v91_v31, %v90_v29 }
  0x99   :  { %v84_v30 = vpop.permute.xlu1 %83 }
  0x9a   :  { %v92_v32 = vmul.f32 %v84_v30, %v72_v28 }
  0x9c   :  { %v95_v36 = vadd.f32 %v94_v34, %v92_v32 }
  0x9d   :  { %v88_v35 = vpop.permute.xlu1 %87 }
  0x9e   :  { %v93_v37 = vmul.f32 %v88_v35, %v73_v33 }
  0xa0   :  { %v96_v38 = vadd.f32 %v95_v36, %v93_v37 }
  0xa2   :  { %v97_v39 = vrot.slane %v96_v38, 4 }
  0xa4   :  { %v98_v40 = vadd.f32 %v97_v39, %v96_v38 }
  0xa6   :  { %v99_v41 = vrot.slane %v98_v40, 2 }
  0xa8   :  { %v100_v42 = vadd.f32 %v99_v41, %v98_v40 }
  0xaa   :  { %v101_v43 = vrot.slane %v100_v42, 1 }
  0xac   :  { %v102_v45 = vadd.f32 %v101_v43, %v100_v42 }
  0xae   :  { %v105_v46 = vadd.f32 %v104_v44, %v102_v45 }
  0xb0   :  { %106 = vst [vmem:[%s170_s3] sm:$0x1] %v105_v46 }

</bundles_post_ra>
